<compile_context>
chip_gen: v7x
topology: tpu7x:2x2x1
jax: 0.10.0
libtpu: 0.0.40
codegen_flags: <defaults>
</compile_context>

<pallas_src>
import jax
import jax.numpy as jnp
from jax import lax
from jax.experimental import pallas as pl
from jax.experimental.pallas import tpu as pltpu


def _round_up(x: int, m: int) -> int:
    return ((x + m - 1) // m) * m


def _make_kernel(tm: int, num_tokens: int):
    """Builds the per-token-tile kernel. `tm` = token-tile rows, static."""

    def kernel(ids_ref,      # (T_pad,)        int32  SMEM  (scalar-prefetched token ids)
               wte_ref,      # (V_rows, E_pad) f32    VMEM  (embedding table, resident)
               w2t_ref,      # (E_pad, V_pad)  bf16   VMEM  (layer2 weight^T, resident)
               b2_ref,       # (1, V_pad)      f32    VMEM  (layer2 bias, resident)
               logits_ref,   # (tm, V_pad)     f32    VMEM  (output tile, lane-dense)
               loss_ref,     # (1, 1)          f32    SMEM  (output scalar)
               emb_ref,      # (tm, E_pad)     f32    VMEM  scratch
               loss_acc_ref  # (1,)            f32    SMEM  scratch accumulator
               ):
        t = pl.program_id(0)
        base = t * tm

        @pl.when(t == 0)
        def _init():
            loss_acc_ref[0] = 0.0

        # ---- Embedding lookup: direct row gather, no one-hot matmul. ----
        # tm is small/static here; at real scale replace with pl.loop or an
        # Element-row-gather BlockSpec that DMAs only the needed rows from HBM.
        for i in range(tm):
            tok = ids_ref[base + i]                       # dynamic SMEM scalar read
            emb_ref[pl.ds(i, 1), :] = wte_ref[pl.ds(tok, 1), :]

        # ---- layer2: (tm, E_pad) @ (E_pad, V_pad) on the MXU, bf16 in / f32 acc. ----
        # TODO(synk): also store wte in bf16 at scale to halve gather DMA traffic.
        emb = emb_ref[...].astype(jnp.bfloat16)
        logits = jnp.dot(emb, w2t_ref[...], preferred_element_type=jnp.float32)
        logits = logits + b2_ref[...]
        logits_ref[...] = logits                          # lane-dense (tm, V_pad) store

        # ---- loss = logits.sum(): mask padded token rows; padded vocab lanes are 0. ----
        row = lax.broadcasted_iota(jnp.int32, logits.shape, 0) + base
        partial = jnp.sum(jnp.where(row < num_tokens, logits, 0.0))
        loss_acc_ref[0] += partial

        @pl.when(t == pl.num_programs(0) - 1)
        def _finalize():
            loss_ref[0, 0] = loss_acc_ref[0]

    return kernel


def boring_model_forward(input_ids, wte, w2, b2, seq_length, *, token_tile=256):
    """Pallas-TPU equivalent of BoringModel.forward -> (loss, logits)."""
    ids = input_ids[:, :seq_length].astype(jnp.int32)     # slice commutes with pointwise ops
    B, S = ids.shape
    V, E = wte.shape
    num_tokens = B * S

    # MXU / lane friendly padding. (Glue; at real scale keep weights stored pre-padded
    # and pre-transposed so this is not per-call work.)
    E_pad = _round_up(E, 128)            # contraction dim full-width
    V_pad = _round_up(V, 128)            # lane-dense logits last dim (unmasked stores)
    V_rows = _round_up(V, 8)             # sublane-aligned embedding rows
    tm = _round_up(min(token_tile, _round_up(num_tokens, 8)), 8)
    T_pad = _round_up(num_tokens, tm)
    n_tiles = T_pad // tm

    ids_flat = jnp.zeros((T_pad,), jnp.int32).at[:num_tokens].set(ids.reshape(-1))
    wte_p = jnp.zeros((V_rows, E_pad), jnp.float32).at[:V, :E].set(wte.astype(jnp.float32))
    w2t_p = jnp.zeros((E_pad, V_pad), jnp.bfloat16).at[:E, :V].set(
        jnp.transpose(w2).astype(jnp.bfloat16))
    b2_p = jnp.zeros((1, V_pad), jnp.float32).at[0, :V].set(b2.astype(jnp.float32))

    kernel = _make_kernel(tm, num_tokens)

    grid_spec = pltpu.PrefetchScalarGridSpec(
        num_scalar_prefetch=1,                 # ids -> SMEM, visible to index_maps & kernel
        grid=(n_tiles,),
        in_specs=[
            pl.BlockSpec((V_rows, E_pad), lambda t, ids: (0, 0)),   # wte   (resident)
            pl.BlockSpec((E_pad, V_pad), lambda t, ids: (0, 0)),    # w2^T  (resident)
            pl.BlockSpec((1, V_pad), lambda t, ids: (0, 0)),        # bias  (resident)
        ],
        out_specs=(
            pl.BlockSpec((tm, V_pad), lambda t, ids: (t, 0)),       # logits tile
            pl.BlockSpec(memory_space=pltpu.SMEM),                  # scalar loss
        ),
        scratch_shapes=[
            pltpu.VMEM((tm, E_pad), jnp.float32),                   # gathered embeddings
            pltpu.SMEM((1,), jnp.float32),                          # loss accumulator
        ],
    )

    logits_padded, loss = pl.pallas_call(
        kernel,
        grid_spec=grid_spec,
        out_shape=(
            jax.ShapeDtypeStruct((T_pad, V_pad), jnp.float32),
            jax.ShapeDtypeStruct((1, 1), jnp.float32),
        ),
        compiler_params=pltpu.CompilerParams(
            # Token axis carries the scalar-loss reduction -> "arbitrary".
            # (Emit per-tile partial losses instead to mark it "parallel" for megacore.)
            dimension_semantics=("arbitrary",),
            vmem_limit_bytes=32 * 1024 * 1024,
        ),
        cost_estimate=pl.CostEstimate(
            flops=2 * T_pad * E_pad * V_pad,
            transcendentals=0,
            bytes_accessed=(ids_flat.size * 4 + wte_p.size * 4 + w2t_p.size * 2
                            + b2_p.size * 4 + T_pad * V_pad * 4),
        ),
    )(ids_flat, wte_p, w2t_p, b2_p)

    # Reshape / un-pad outside the kernel (free XLA layout plumbing).
    logits = logits_padded[:num_tokens, :V].reshape(B, S, V)
    return loss[0, 0], logits


if __name__ == "__main__":
    # Small shapes consistent with the module: target_seq_length=6, vocab=32, embed=10.
    B = 2
    INPUT_SEQ = 8
    TARGET_SEQ_LENGTH = 6
    VOCAB_SIZE = 32
    EMBED_SIZE = 10

    key = jax.random.PRNGKey(0)
    k_ids, k_wte, k_w2, k_b2 = jax.random.split(key, 4)

    input_ids = jax.random.randint(k_ids, (B, INPUT_SEQ), 0, VOCAB_SIZE, dtype=jnp.int32)
    # Deterministic synthetic parameters (not a checkpoint).
    wte = jax.random.normal(k_wte, (VOCAB_SIZE, EMBED_SIZE), dtype=jnp.float32) * 0.02
    w2 = jax.random.normal(k_w2, (VOCAB_SIZE, EMBED_SIZE), dtype=jnp.float32) * 0.02
    b2 = jax.random.normal(k_b2, (VOCAB_SIZE,), dtype=jnp.float32) * 0.02

    # token_tile=8 so the demo exercises a 2-step grid (12 real tokens -> 16 padded).
    loss, logits = boring_model_forward(input_ids, wte, w2, b2, TARGET_SEQ_LENGTH,
                                        token_tile=8)
    jax.block_until_ready((loss, logits))

    # Pure-JAX f32 reference (PyTorch semantics). The kernel feeds the MXU bf16 inputs
    # with f32 accumulation, so tolerances reflect bf16 input rounding.
    ref_logits = jnp.take(wte, input_ids[:, :TARGET_SEQ_LENGTH], axis=0) @ w2.T + b2
    ref_loss = ref_logits.sum()
    assert logits.shape == (B, TARGET_SEQ_LENGTH, VOCAB_SIZE)
    assert jnp.allclose(logits, ref_logits, atol=1e-3, rtol=1e-2)
    assert jnp.allclose(loss, ref_loss, atol=1e-2, rtol=1e-2)

    print("KERNEL_OK")
</pallas_src>

<mosaic_0001>
module attributes {stable_mosaic.version = 11 : i64} {
  func.func @kernel(%arg0: i32, %arg1: memref<16xi32, #tpu.memory_space<smem>>, %arg2: memref<32x128xf32, #tpu.memory_space<vmem>>, %arg3: memref<128x128xbf16, #tpu.memory_space<vmem>>, %arg4: memref<1x128xf32, #tpu.memory_space<vmem>>, %arg5: memref<8x128xf32, #tpu.memory_space<vmem>>, %arg6: memref<1x1xf32, #tpu.memory_space<smem>>, %arg7: memref<8x128xf32, #tpu.memory_space<vmem>>, %arg8: memref<1xf32, #tpu.memory_space<smem>>) attributes {dimension_semantics = [#tpu.dimension_semantics<arbitrary>], iteration_bounds = array<i64: 2>, scalar_prefetch = 1 : i64, scratch_operands = 2 : i64, tpu.core_type = #tpu.core_type<tc>, window_params = [{pipeline_mode = #tpu.pipeline_mode<synchronous>, transform_indices = @transform_0, window_bounds = array<i64: 32, 128>}, {pipeline_mode = #tpu.pipeline_mode<synchronous>, transform_indices = @transform_1, window_bounds = array<i64: 128, 128>}, {pipeline_mode = #tpu.pipeline_mode<synchronous>, transform_indices = @transform_2, window_bounds = array<i64: 1, 128>}, {transform_indices = @transform_3, window_bounds = array<i64: 8, 128>}, {transform_indices = @transform_4, window_bounds = array<i64: 1, 1>}]} {
    %c8_i32 = arith.constant 8 : i32
    %0 = arith.muli %arg0, %c8_i32 : i32
    %c0_i32 = arith.constant 0 : i32
    %1 = arith.cmpi eq, %arg0, %c0_i32 : i32
    %2 = arith.extui %1 : i1 to i32
    %c0_i32_0 = arith.constant 0 : i32
    %3 = arith.cmpi ne, %2, %c0_i32_0 : i32
    scf.if %3 {
      %cst_32 = arith.constant 0.000000e+00 : f32
      %c0_33 = arith.constant 0 : index
      %77 = memref.load %arg8[%c0_33] : memref<1xf32, #tpu.memory_space<smem>>
      memref.store %cst_32, %arg8[%c0_33] : memref<1xf32, #tpu.memory_space<smem>>
    } else {
    }
    %c0_i32_1 = arith.constant 0 : i32
    %4 = arith.addi %0, %c0_i32_1 : i32
    %5 = arith.index_cast %4 : i32 to index
    %6 = memref.load %arg1[%5] : memref<16xi32, #tpu.memory_space<smem>>
    %7 = arith.index_cast %6 : i32 to index
    %c0 = arith.constant 0 : index
    %8 = vector.load %arg2[%7, %c0] : memref<32x128xf32, #tpu.memory_space<vmem>>, vector<1x128xf32>
    %c0_2 = arith.constant 0 : index
    %c0_3 = arith.constant 0 : index
    %9 = vector.load %arg7[%c0_2, %c0_3] : memref<8x128xf32, #tpu.memory_space<vmem>>, vector<1x128xf32>
    tpu.vector_store %arg7[%c0_2, %c0_3], %8 {strides = array<i32>} : memref<8x128xf32, #tpu.memory_space<vmem>>, vector<1x128xf32>,
    %c1_i32 = arith.constant 1 : i32
    %10 = arith.addi %0, %c1_i32 : i32
    %11 = arith.index_cast %10 : i32 to index
    %12 = memref.load %arg1[%11] : memref<16xi32, #tpu.memory_space<smem>>
    %13 = arith.index_cast %12 : i32 to index
    %c0_4 = arith.constant 0 : index
    %14 = vector.load %arg2[%13, %c0_4] : memref<32x128xf32, #tpu.memory_space<vmem>>, vector<1x128xf32>
    %c1 = arith.constant 1 : index
    %c0_5 = arith.constant 0 : index
    %15 = vector.load %arg7[%c1, %c0_5] : memref<8x128xf32, #tpu.memory_space<vmem>>, vector<1x128xf32>
    tpu.vector_store %arg7[%c1, %c0_5], %14 {strides = array<i32>} : memref<8x128xf32, #tpu.memory_space<vmem>>, vector<1x128xf32>,
    %c2_i32 = arith.constant 2 : i32
    %16 = arith.addi %0, %c2_i32 : i32
    %17 = arith.index_cast %16 : i32 to index
    %18 = memref.load %arg1[%17] : memref<16xi32, #tpu.memory_space<smem>>
    %19 = arith.index_cast %18 : i32 to index
    %c0_6 = arith.constant 0 : index
    %20 = vector.load %arg2[%19, %c0_6] : memref<32x128xf32, #tpu.memory_space<vmem>>, vector<1x128xf32>
    %c2 = arith.constant 2 : index
    %c0_7 = arith.constant 0 : index
    %21 = vector.load %arg7[%c2, %c0_7] : memref<8x128xf32, #tpu.memory_space<vmem>>, vector<1x128xf32>
    tpu.vector_store %arg7[%c2, %c0_7], %20 {strides = array<i32>} : memref<8x128xf32, #tpu.memory_space<vmem>>, vector<1x128xf32>,
    %c3_i32 = arith.constant 3 : i32
    %22 = arith.addi %0, %c3_i32 : i32
    %23 = arith.index_cast %22 : i32 to index
    %24 = memref.load %arg1[%23] : memref<16xi32, #tpu.memory_space<smem>>
    %25 = arith.index_cast %24 : i32 to index
    %c0_8 = arith.constant 0 : index
    %26 = vector.load %arg2[%25, %c0_8] : memref<32x128xf32, #tpu.memory_space<vmem>>, vector<1x128xf32>
    %c3 = arith.constant 3 : index
    %c0_9 = arith.constant 0 : index
    %27 = vector.load %arg7[%c3, %c0_9] : memref<8x128xf32, #tpu.memory_space<vmem>>, vector<1x128xf32>
    tpu.vector_store %arg7[%c3, %c0_9], %26 {strides = array<i32>} : memref<8x128xf32, #tpu.memory_space<vmem>>, vector<1x128xf32>,
    %c4_i32 = arith.constant 4 : i32
    %28 = arith.addi %0, %c4_i32 : i32
    %29 = arith.index_cast %28 : i32 to index
    %30 = memref.load %arg1[%29] : memref<16xi32, #tpu.memory_space<smem>>
    %31 = arith.index_cast %30 : i32 to index
    %c0_10 = arith.constant 0 : index
    %32 = vector.load %arg2[%31, %c0_10] : memref<32x128xf32, #tpu.memory_space<vmem>>, vector<1x128xf32>
    %c4 = arith.constant 4 : index
    %c0_11 = arith.constant 0 : index
    %33 = vector.load %arg7[%c4, %c0_11] : memref<8x128xf32, #tpu.memory_space<vmem>>, vector<1x128xf32>
    tpu.vector_store %arg7[%c4, %c0_11], %32 {strides = array<i32>} : memref<8x128xf32, #tpu.memory_space<vmem>>, vector<1x128xf32>,
    %c5_i32 = arith.constant 5 : i32
    %34 = arith.addi %0, %c5_i32 : i32
    %35 = arith.index_cast %34 : i32 to index
    %36 = memref.load %arg1[%35] : memref<16xi32, #tpu.memory_space<smem>>
    %37 = arith.index_cast %36 : i32 to index
    %c0_12 = arith.constant 0 : index
    %38 = vector.load %arg2[%37, %c0_12] : memref<32x128xf32, #tpu.memory_space<vmem>>, vector<1x128xf32>
    %c5 = arith.constant 5 : index
    %c0_13 = arith.constant 0 : index
    %39 = vector.load %arg7[%c5, %c0_13] : memref<8x128xf32, #tpu.memory_space<vmem>>, vector<1x128xf32>
    tpu.vector_store %arg7[%c5, %c0_13], %38 {strides = array<i32>} : memref<8x128xf32, #tpu.memory_space<vmem>>, vector<1x128xf32>,
    %c6_i32 = arith.constant 6 : i32
    %40 = arith.addi %0, %c6_i32 : i32
    %41 = arith.index_cast %40 : i32 to index
    %42 = memref.load %arg1[%41] : memref<16xi32, #tpu.memory_space<smem>>
    %43 = arith.index_cast %42 : i32 to index
    %c0_14 = arith.constant 0 : index
    %44 = vector.load %arg2[%43, %c0_14] : memref<32x128xf32, #tpu.memory_space<vmem>>, vector<1x128xf32>
    %c6 = arith.constant 6 : index
    %c0_15 = arith.constant 0 : index
    %45 = vector.load %arg7[%c6, %c0_15] : memref<8x128xf32, #tpu.memory_space<vmem>>, vector<1x128xf32>
    tpu.vector_store %arg7[%c6, %c0_15], %44 {strides = array<i32>} : memref<8x128xf32, #tpu.memory_space<vmem>>, vector<1x128xf32>,
    %c7_i32 = arith.constant 7 : i32
    %46 = arith.addi %0, %c7_i32 : i32
    %47 = arith.index_cast %46 : i32 to index
    %48 = memref.load %arg1[%47] : memref<16xi32, #tpu.memory_space<smem>>
    %49 = arith.index_cast %48 : i32 to index
    %c0_16 = arith.constant 0 : index
    %50 = vector.load %arg2[%49, %c0_16] : memref<32x128xf32, #tpu.memory_space<vmem>>, vector<1x128xf32>
    %c7 = arith.constant 7 : index
    %c0_17 = arith.constant 0 : index
    %51 = vector.load %arg7[%c7, %c0_17] : memref<8x128xf32, #tpu.memory_space<vmem>>, vector<1x128xf32>
    tpu.vector_store %arg7[%c7, %c0_17], %50 {strides = array<i32>} : memref<8x128xf32, #tpu.memory_space<vmem>>, vector<1x128xf32>,
    %c0_18 = arith.constant 0 : index
    %c0_19 = arith.constant 0 : index
    %52 = vector.load %arg7[%c0_18, %c0_19] : memref<8x128xf32, #tpu.memory_space<vmem>>, vector<8x128xf32>
    %53 = arith.truncf %52 : vector<8x128xf32> to vector<8x128xbf16>
    %c0_20 = arith.constant 0 : index
    %c0_21 = arith.constant 0 : index
    %54 = vector.load %arg3[%c0_20, %c0_21] : memref<128x128xbf16, #tpu.memory_space<vmem>>, vector<128x128xbf16>
    %cst = arith.constant dense<0.000000e+00> : vector<8x128xf32>
    %55 = tpu.matmul %53, %54, %cst {dimension_numbers = #tpu.dot_dimension_numbers<[1], [0], [0], [1], [0, 0, 1, 1], [], []>} : vector<8x128xbf16>, vector<128x128xbf16>, vector<8x128xf32> -> vector<8x128xf32>
    %c0_22 = arith.constant 0 : index
    %c0_23 = arith.constant 0 : index
    %56 = vector.load %arg4[%c0_22, %c0_23] : memref<1x128xf32, #tpu.memory_space<vmem>>, vector<1x128xf32>
    %57 = vector.broadcast %56 : vector<1x128xf32> to vector<8x128xf32>
    %58 = arith.addf %55, %57 : vector<8x128xf32>
    %c0_24 = arith.constant 0 : index
    %c0_25 = arith.constant 0 : index
    %59 = vector.load %arg5[%c0_24, %c0_25] : memref<8x128xf32, #tpu.memory_space<vmem>>, vector<8x128xf32>
    tpu.vector_store %arg5[%c0_24, %c0_25], %58 {strides = array<i32>} : memref<8x128xf32, #tpu.memory_space<vmem>>, vector<8x128xf32>,
    %60 = tpu.iota {dimensions = array<i32: 0>} : vector<8x128xi32>
    %61 = vector.broadcast %0 : i32 to vector<8x128xi32>
    %62 = arith.addi %60, %61 : vector<8x128xi32>
    %c12_i32 = arith.constant 12 : i32
    %63 = vector.broadcast %c12_i32 : i32 to vector<8x128xi32>
    %64 = arith.cmpi slt, %62, %63 : vector<8x128xi32>
    %cst_26 = arith.constant 0.000000e+00 : f32
    %65 = vector.broadcast %cst_26 : f32 to vector<8x128xf32>
    %66 = arith.select %64, %58, %65 : vector<8x128xi1>, vector<8x128xf32>
    %67 = vector.shape_cast %66 : vector<8x128xf32> to vector<1x8x128xf32>
    %cst_27 = arith.constant dense<0.000000e+00> : vector<1xf32>
    %68 = vector.multi_reduction <add>, %67, %cst_27 [1, 2] : vector<1x8x128xf32> to vector<1xf32>
    %69 = vector.shape_cast %68 : vector<1xf32> to vector<1x1x1xf32>
    %70 = vector.extract %69[0, 0, 0] : f32 from vector<1x1x1xf32>
    %c0_28 = arith.constant 0 : index
    %71 = memref.load %arg8[%c0_28] : memref<1xf32, #tpu.memory_space<smem>>
    %72 = arith.addf %71, %70 : f32
    %c0_29 = arith.constant 0 : index
    %73 = memref.load %arg8[%c0_29] : memref<1xf32, #tpu.memory_space<smem>>
    memref.store %72, %arg8[%c0_29] : memref<1xf32, #tpu.memory_space<smem>>
    %c1_i32_30 = arith.constant 1 : i32
    %74 = arith.cmpi eq, %arg0, %c1_i32_30 : i32
    %75 = arith.extui %74 : i1 to i32
    %c0_i32_31 = arith.constant 0 : i32
    %76 = arith.cmpi ne, %75, %c0_i32_31 : i32
    scf.if %76 {
      %c0_32 = arith.constant 0 : index
      %77 = memref.load %arg8[%c0_32] : memref<1xf32, #tpu.memory_space<smem>>
      %c0_33 = arith.constant 0 : index
      %c0_34 = arith.constant 0 : index
      %78 = memref.load %arg6[%c0_33, %c0_34] : memref<1x1xf32, #tpu.memory_space<smem>>
      memref.store %77, %arg6[%c0_33, %c0_34] : memref<1x1xf32, #tpu.memory_space<smem>>
    } else {
    }
    return
  }
  func.func @transform_0(%arg0: i32, %arg1: memref<16xi32, #tpu.memory_space<smem>>) -> (i32, i32) {
    %c0_i32 = arith.constant 0 : i32
    %c0_i32_0 = arith.constant 0 : i32
    %c0_i32_1 = arith.constant 0 : i32
    return %c0_i32, %c0_i32_0 : i32, i32
  }
  func.func @transform_1(%arg0: i32, %arg1: memref<16xi32, #tpu.memory_space<smem>>) -> (i32, i32) {
    %c0_i32 = arith.constant 0 : i32
    %c0_i32_0 = arith.constant 0 : i32
    %c0_i32_1 = arith.constant 0 : i32
    return %c0_i32, %c0_i32_0 : i32, i32
  }
  func.func @transform_2(%arg0: i32, %arg1: memref<16xi32, #tpu.memory_space<smem>>) -> (i32, i32) {
    %c0_i32 = arith.constant 0 : i32
    %c0_i32_0 = arith.constant 0 : i32
    %c0_i32_1 = arith.constant 0 : i32
    return %c0_i32, %c0_i32_0 : i32, i32
  }
  func.func @transform_3(%arg0: i32, %arg1: memref<16xi32, #tpu.memory_space<smem>>) -> (i32, i32) {
    %c0_i32 = arith.constant 0 : i32
    %c0_i32_0 = arith.constant 0 : i32
    return %arg0, %c0_i32 : i32, i32
  }
  func.func @transform_4(%arg0: i32, %arg1: memref<16xi32, #tpu.memory_space<smem>>) -> (i32, i32) {
    %c0_i32 = arith.constant 0 : i32
    %c0_i32_0 = arith.constant 0 : i32
    %c0_i32_1 = arith.constant 0 : i32
    return %c0_i32, %c0_i32_0 : i32, i32
  }
}

</mosaic_0001>

<bundles_post_ra>
// kernel: tpu_custom_call.1
= control target key start
LH: loop header
LB: loop body
LE: loop exit
PB: predicated region body
PF: predicated region fallthrough
CT: control target
= control target key end

     0   :  { %s1078_s0 = inlined_call_operand.hbm [shape: s32[16], index: 0, kind: input, shape index: {}]   ;;  %s1079_s1 = inlined_call_operand.hbm [shape: f32[32,128], index: 1, kind: input, shape index: {}]   ;;  %s1080_s2 = inlined_call_operand.hbm [shape: bf16[128,128], index: 2, kind: input, shape index: {}]   ;;  %s1081_s3 = inlined_call_operand.vmem [shape: f32[1,128], index: 3, kind: input, shape index: {}]   ;;  %s1082_s4 = inlined_call_operand.hbm [shape: f32[16,128], index: 4, kind: output, shape index: {0}]   ;;  %s1083_s5 = inlined_call_operand.hbm [shape: f32[1,1], index: 5, kind: output, shape index: {1}]  }
   0x1   :  { %s657_s20 = scalar_lea.hbm %s1078_s0, 16 }
   0x2   :  { %p658_p0 = scmp.ne.s32.totalorder %s1078_s0, %s657_s20  ;;  %p661_p1 = scmp.lt.u32.totalorder %s657_s20, %s1078_s0 }
   0x4   :  { %p663_p2 = pnand %p661_p1, %p658_p0 }
   0x6   :  { %666 = shalt.err (!%p663_p2)  }
   0x7   :  { %s813_s25 = smov [#allocation5]  }
   0x8   :  { %12 = dma.hbm_to_smem %s1078_s0, 16, %s813_s25, [#allocation4] }
   0x9   :  { %779 = dma.done.wait [#allocation4], 16 }
   0xa   :  { %780 = vsyncadd [#allocation4], 4294967280 }
   0xb   :  { %14 = sfence }
   0xc   :  { %15 = vsyncpa [#allocation7], 0 }
   0xd   :  { %16 = vsyncpa [#allocation11], 0 }
   0xe   :  { %17 = vsyncpa [#allocation8], 0 }
   0xf   :  { %19 = vsyncpa [#allocation8 + $0x1], 0 }
  0x10   :  { %20 = vsyncpa [#allocation9], 0  ;;  %s867_s28 = smov 0   ;;  %s869_s29 = smov 0  }
  0x11   :  { %s871_s30 = smov 0   ;;  %s873_s6 = smov 0  }
  0x12 LB: > { %s888_s0 = sadd.s32 4294967295, %s811_s6   ;;  %s511_s7 = sadd.s32 4294967294, %s811_s6   ;;  %s811_s6 = sphi %s873_s6, %s1108_s6   ;;  %s807_s30 = sphi %s871_s30, %s1107_s30   ;;  %s803_s29 = sphi %s869_s29, %s1106_s29   ;;  %s799_s28 = sphi %s867_s28, %s1105_s28  }
  0x13   : > { %s892_s8 = sadd.s32 1, %s811_s6   ;;  %s96_s9 = sadd.s32 1, %s807_s30 }
  0x14   : > { %s93_s10 = ssub.s32 %s811_s6, %s892_s8  ;;  %p106_p3 = scmp.ne.s32.totalorder %s807_s30, %s803_s29 }
  0x15   : > { %p94_p4 = scmp.eq.s32.totalorder %s93_s10, 0  ;;  %p1084_p5 = scmp.eq.s32.totalorder %s888_s0, 1 }
  0x16   : > { %p112_p6 = scmp.ne.s32.totalorder %s803_s29, %s799_s28  ;;  %p113_p7 = scmp.eq.s32.totalorder %s511_s7, 1 }
  0x17   : > { %s903_s11 = scalar_select %p94_p4, %s807_s30, %s96_s9  }
  0x18   : > { %p907_p8 = por %p1084_p5, %p106_p3  ;;  %p911_p9 = por %p113_p7, %p112_p6 }
  0x19   : > { %p512_p10 = scmp.ge.s32.totalorder %s811_s6, 1  ;;  %p141_p11 = scmp.lt.s32.totalorder %s811_s6, 3 }
  0x1a   : > { %s1088_s12 = scalar_select %p907_p8, 1, 0 }
  0x1b   : > { %s1089_s13 = scalar_select %p911_p9, 1, 0 }
  0x1c   : > { %p1085_p12 = scmp.eq.s32.totalorder %s888_s0, 0  ;;  %p918_p13 = pnand %p512_p10, %p141_p11 }
  0x1d   : > { %s814_s15 = smov [#allocation6]   ;;  %s815_s18 = smov [#allocation10]  }
  0x1e   : > { %s1090_s14 = scalar_select %p918_p13, 1, 0 }
  0x1f   : > { %s153_s16 = sshll.u32 %s814_s15, 4  ;;  %p586_p0 = pneg %p918_p13  ;;  %s154_s16 = int_to_ptr.vmem [resolvable:$true] %s153_s16 }
  0x20   : > { %s166_s19 = sshll.u32 %s815_s18, 4  ;;  %s667_s22 = scalar_lea.hbm %s1079_s1, 512  ;;  %s930_s19 = int_to_ptr.vmem [resolvable:$true] %s166_s19 }
  0x21   : > { %p926_p1 = pnand %p1085_p12, %p586_p0  ;;  %p668_p2 = scmp.ne.s32.totalorder %s1079_s1, %s667_s22 }
  0x22   : > { %p674_p7 = scmp.lt.u32.totalorder %s667_s22, %s1079_s1 }
  0x23   : > { %p669_p3 = pneg %p926_p1 }
  0x25   : > { %p670_p4 = pnand %p669_p3, %p668_p2 }
  0x27   : > { %p671_p6 = pneg %p670_p4 }
  0x29   : > { %p676_p10 = pnand %p674_p7, %p671_p6 }
  0x2b   : > { %679 = shalt.err (!%p676_p10)
}
  0x2c   : > { %s680_s27 = scalar_lea.vmem %s154_s16, 512  ;;  %p688_p12 = scmp.lt.s32.totalorder %s154_s16, %s154_s16 }
  0x2d   : > { %p681_p11 = scmp.ne.s32.totalorder %s154_s16, %s680_s27  ;;  %p689_p9 = scmp.lt.s32.totalorder %s680_s27, %s680_s27 }
  0x2f   : > { %p683_p0 = pnand %p681_p11, %p669_p3  ;;  %p690_p8 = por %p689_p9, %p688_p12 }
  0x31   : > { %p684_p5 = pneg %p683_p0 }
  0x33   : > { %p691_p13 = pnand %p690_p8, %p684_p5 }
  0x35   : > { %694 = shalt.err (!%p691_p13)
}
  0x36   : > { %s816_s7 = smov 128   ;;  %s817_s9 = smov 8  }
  0x37   : > { %589 = dma.hbm_to_vmem [thread:$0]  (!%p926_p1), %s1079_s1, 512, %s154_s16, [#allocation7], %s816_s7, %s816_s7, %s817_s9  }
  0x38   : > { %s695_s21 = scalar_lea.hbm %s1080_s2, 1024 }
  0x39   : > { %p696_p2 = scmp.ne.s32.totalorder %s1080_s2, %s695_s21  ;;  %p702_p9 = scmp.lt.u32.totalorder %s695_s21, %s1080_s2 }
  0x3b   : > { %p698_p5 = pnand %p696_p2, %p669_p3 }
  0x3d   : > { %p699_p8 = pneg %p698_p5 }
  0x3f   : > { %p704_p12 = pnand %p702_p9, %p699_p8 }
  0x41   : > { %707 = shalt.err (!%p704_p12)
}
  0x42   : > { %s708_s16 = scalar_lea.vmem %s930_s19, 1024  ;;  %p716_p7 = scmp.lt.s32.totalorder %s930_s19, %s930_s19 }
  0x43   : > { %p709_p13 = scmp.ne.s32.totalorder %s930_s19, %s708_s16  ;;  %p717_p10 = scmp.lt.s32.totalorder %s708_s16, %s708_s16 }
  0x45   : > { %p711_p4 = pnand %p709_p13, %p669_p3  ;;  %p718_p11 = por %p717_p10, %p716_p7 }
  0x47   : > { %p712_p6 = pneg %p711_p4 }
  0x49   : > { %p719_p0 = pnand %p718_p11, %p712_p6 }
  0x4b   : > { %722 = shalt.err (!%p719_p0)
}
  0x4c   : > { %s818_s26 = smov 64   ;;  %s819_s27 = smov 4  }
  0x4d   : > { %592 = dma.hbm_to_vmem [thread:$0]  (!%p926_p1), %s1080_s2, 1024, %s930_s19, [#allocation11], %s818_s26, %s818_s26, %s819_s27  }
  0x4e   : > { %p1092_p2 = scmp.ne.s32.totalorder %s1090_s14, 0 }
  0x4f   : > { %p1093_p3 = scmp.eq.s32.totalorder (!%p1092_p2), %s888_s0, 0 }
  0x50   : > { %185 = sbr.rel (%p1092_p2) target bundleno = 556 (0x22c), region = 32 }
  0x57   : > { %782 = dma.done.wait (%p1093_p3), [#allocation7], 512   ;;  %p1094_p5 = pmov %p1093_p3 }
  0x58   : > { %p1095_p8 = pmov %p1093_p3 }
  0x59   : > { %784 = vsyncadd (%p1094_p5), [#allocation7], 4294966784 }
  0x5a   : > { %786 = dma.done.wait (%p1095_p8), [#allocation11], 1024   ;;  %p1096_p9 = pmov %p1093_p3 }
  0x5b   : > { %s990_s17 = sshll.u32 %s888_s0, 3  ;;  %v820_v0 = vmov 0.0   ;;  %vm821_vm0 = vmmov 0   ;;  %v649_v1 = vld [vmem:[#allocation10] sm:$0xff]   ;;  %v650_v2 = vld [vmem:[#allocation10 + $0x8] sm:$0xff]   ;;  %v651_v3 = vld [vmem:[#allocation10 + $0x10] sm:$0xff]   ;;  %v371_v19 = vlaneseq  ;;  %p1097_p1 = pmov %p1093_p3 }
  0x5c   : > { %788 = vsyncadd (%p1096_p9), [#allocation11], 4294966272  ;;  %546 = vmatprep.subr.bf16.mxu0 %v820_v0  ;;  %562 = vmatprep.mubr.msk.bf16.mxu0 %vm821_vm0, %v820_v0  ;;  %s218_s14 = sld [smem:[#allocation5 + %s990_s17]]  ;;  %s222_s19 = sadd.s32 1, %s990_s17  ;;  %v652_v10 = vld [vmem:[#allocation10 + $0x18] sm:$0xff]   ;;  %v653_v12 = vld [vmem:[#allocation10 + $0x20] sm:$0xff]   ;;  %v373_v21 = vstv %s990_s17 }
  0x5d   : > { %s223_s10 = sld [smem:[#allocation5 + %s222_s19]]  ;;  %s227_s15 = sadd.s32 2, %s990_s17  ;;  %547 = vmatpush3.bf16.msra.mxu0 %v649_v1  ;;  %v654_v14 = vld [vmem:[#allocation10 + $0x28] sm:$0xff]   ;;  %v655_v15 = vld [vmem:[#allocation10 + $0x30] sm:$0xff]   ;;  %v656_v16 = vld [vmem:[#allocation10 + $0x38] sm:$0xff]   ;;  %v372_v20 = vshrl.u32 %v371_v19, 7 }
  0x5e   : > { %s228_s18 = sld [smem:[#allocation5 + %s227_s15]]  ;;  %s232_s20 = sadd.s32 3, %s990_s17  ;;  %548 = vmatprep.subr.bf16.mxu0 %v820_v0  ;;  %v521_v23 = vld [vmem:[%s1081_s3] ss:$0 sm:$0xff] }
  0x5f   : > { %s233_s21 = sld [smem:[#allocation5 + %s232_s20]]  ;;  %s237_s22 = sadd.s32 4, %s990_s17  ;;  %v374_v22 = vadd.s32 %v373_v21, %v372_v20 }
  0x60   : > { %s238_s23 = sld [smem:[#allocation5 + %s237_s22]]  ;;  %s242_s24 = sadd.s32 5, %s990_s17 }
  0x61   : > { %s243_s25 = sld [smem:[#allocation5 + %s242_s24]]  ;;  %s247_s16 = sadd.s32 6, %s990_s17  ;;  %549 = vmatpush3.bf16.msra.mxu0 %v650_v2  ;;  %vm375_vm1 = vcmp.lt.s32.totalorder %v374_v22, 12 }
  0x62   : > { %s248_s26 = sld [smem:[#allocation5 + %s247_s16]]  ;;  %550 = vmatprep.subr.bf16.mxu0 %v820_v0  ;;  %s252_s27 = sadd.s32 7, %s990_s17 }
  0x63   : > { %s219_s7 = scalar_lea.vmem [#allocation6], %s218_s14  ;;  %s224_s9 = scalar_lea.vmem [#allocation6], %s223_s10 }
  0x64   : > { %v220_v4 = vld [vmem:[%s219_s7] sm:$0x1]  ;;  %s229_s19 = scalar_lea.vmem [#allocation6], %s228_s18  ;;  %s253_s14 = sld [smem:[#allocation5 + %s252_s27]] }
  0x65   : > { %v225_v5 = vld [vmem:[%s224_s9] sm:$0x1]  ;;  %221 = vst [vmem:[#allocation2] sm:$0x1] %v220_v4  ;;  %s234_s15 = scalar_lea.vmem [#allocation6], %s233_s21  ;;  %551 = vmatpush3.bf16.msra.mxu0 %v651_v3  ;;  %s205_s21 = sand.u32 1, %s803_s29  }
  0x66   : > { %v230_v6 = vld [vmem:[%s229_s19] sm:$0x1]  ;;  %226 = vst [vmem:[#allocation2 + $0x1] sm:$0x1] %v225_v5  ;;  %s239_s20 = scalar_lea.vmem [#allocation6], %s238_s23  ;;  %552 = vmatprep.subr.bf16.mxu0 %v820_v0  ;;  %s518_s23 = sshll.u32 %s205_s21, 3 }
  0x67   : > { %231 = vst [vmem:[#allocation2 + $0x2] sm:$0x1] %v230_v6  ;;  %v235_v7 = vld [vmem:[%s234_s15] sm:$0x1]  ;;  %s244_s22 = scalar_lea.vmem [#allocation6], %s243_s25  ;;  %s207_s16 = scalar_lea.vmem [#allocation12], %s518_s23 }
  0x68   : > { %v240_v8 = vld [vmem:[%s239_s20] sm:$0x1]  ;;  %236 = vst [vmem:[#allocation2 + $0x3] sm:$0x1] %v235_v7  ;;  %s249_s10 = scalar_lea.vmem [#allocation6], %s248_s26  ;;  %s822_s17 = smov 0.0  }
  0x69   : > { %v245_v9 = vld [vmem:[%s244_s22] sm:$0x1]  ;;  %241 = vst [vmem:[#allocation2 + $0x4] sm:$0x1] %v240_v8  ;;  %553 = vmatpush3.bf16.msra.mxu0 %v652_v10  ;;  %577 = sst [smem:[#allocation3]] (%p1097_p1), %s822_s17  ;;  %s532_s26 = sshll.u32 %s888_s0, 7 }
  0x6a   : > { %246 = vst [vmem:[#allocation2 + $0x5] sm:$0x1] %v245_v9  ;;  %v250_v11 = vld [vmem:[%s249_s10] sm:$0x1]  ;;  %554 = vmatprep.subr.bf16.mxu0 %v820_v0  ;;  %s254_s18 = scalar_lea.vmem [#allocation6], %s253_s14  ;;  %s411_s27 = sshll.u32 %s207_s16, 4  ;;  %s412_s27 = int_to_ptr.vmem [resolvable:$true] %s411_s27 }
  0x6b   : > { %251 = vst [vmem:[#allocation2 + $0x6] sm:$0x1] %v250_v11  ;;  %v255_v13 = vld [vmem:[%s254_s18] sm:$0x1]  ;;  %s1020_s19 = scalar_lea.hbm %s1082_s4, %s532_s26  ;;  %s398_s15 = scalar_lea.sflag [#allocation8], %s205_s21 }
  0x6c   : > { %256 = vst [vmem:[#allocation2 + $0x7] sm:$0x1] %v255_v13  ;;  %s723_s20 = scalar_lea.vmem %s412_s27, 128  ;;  %p1098_p13 = scmp.ne.s32.totalorder %s1088_s12, 0 }
  0x6d   : > { %555 = vmatpush3.bf16.msra.mxu0 %v653_v12  ;;  %p724_p12 = scmp.ne.s32.totalorder %s412_s27, %s723_s20  ;;  %s823_s22 = smov [#allocation12]  }
  0x6e   : > { %556 = vmatprep.subr.bf16.mxu0 %v820_v0  ;;  %s727_s14 = sshll.u32 %s823_s22, 4  ;;  %s728_s14 = int_to_ptr.vmem [resolvable:$false] %s727_s14 }
  0x6f   : > { %p725_p4 = pnand %p724_p12, %p1098_p13  ;;  %s729_s10 = scalar_lea.vmem %s728_s14, 256 }
  0x70   : > { %p730_p7 = scmp.lt.s32.totalorder %s412_s27, %s728_s14  ;;  %p731_p10 = scmp.lt.s32.totalorder %s729_s10, %s723_s20 }
  0x71   : > { %557 = vmatpush3.bf16.msra.mxu0 %v654_v14  ;;  %p726_p6 = pneg %p725_p4 }
  0x72   : > { %558 = vmatprep.subr.bf16.mxu0 %v820_v0  ;;  %p732_p11 = por %p731_p10, %p730_p7 }
  0x73   : > { %v257_v17 = vld [vmem:[#allocation2] sm:$0xff] }
  0x74   : > { %v258_v18 = vpack.c.bf16 %v257_v17, %v257_v17  ;;  %p733_p0 = pnand %p732_p11, %p726_p6 }
  0x75   : > { %559 = vmatpush3.bf16.msra.mxu0 %v655_v15 }
  0x76   : > { %560 = vmatprep.subr.bf16.mxu0 %v820_v0 }
  0x79   : > { %561 = vmatpush3.bf16.msra.mxu0 %v656_v16 }
  0x7c   : > { %563 = vmatmul.mubr.bf16.vlgmr.msra.gmra.mrb[0].mxu0 %v258_v18 }
 0x14f   : > { %v364_v24 = vpop.f32.mrb[0].mxu0 }
 0x150   : > { %v365_v25 = vadd.f32 %v521_v23, %v364_v24  ;;  %v564_v26 = vpop.f32.mrb[1].mxu0 }
 0x151   : > { %v367_v27 = vpop.f32.mrb[2].mxu0 }
 0x152   : > { %370 = vst [vmem:[%s207_s16] sm:$0xff] %v365_v25  ;;  %v565_v28 = vpop.f32.mrb[3].mxu0  ;;  %v376_v29 = vsel %vm375_vm1, %v365_v25, 0.0 }
 0x153   : > { %377 = vadd.xlane.f32.xlu0 %v376_v29 }
 0x154   : > { %736 = shalt.err (!%p733_p0)
}
 0x155   : > { %s737_s18 = scalar_lea.hbm %s1020_s19, 128  ;;  %s741_s24 = scalar_lea.hbm %s1082_s4, 256 }
 0x156   : > { %p738_p2 = scmp.ne.s32.totalorder %s1020_s19, %s737_s18  ;;  %p742_p8 = scmp.lt.u32.totalorder %s1020_s19, %s1082_s4 }
 0x157   : > { %p743_p9 = scmp.lt.u32.totalorder %s741_s24, %s737_s18  ;;  %p745_p12 = scmp.lt.u32.totalorder %s737_s18, %s1020_s19 }
 0x158   : > { %p739_p3 = pnand %p738_p2, %p1098_p13 }
 0x159   : > { %p744_p1 = por %p743_p9, %p742_p8 }
 0x15a   : > { %p740_p5 = pneg %p739_p3 }
 0x15b   : > { %p746_p4 = por %p745_p12, %p744_p1 }
 0x15d   : > { %p747_p6 = pnand %p746_p4, %p740_p5 }
 0x15f   : > { %750 = shalt.err (!%p747_p6)
}
 0x160   : > { %580 = dma.vmem_to_hbm [thread:$0]  (%p1098_p13), %s412_s27, 128, %s1020_s19, %s398_s15  }
 0x161   : > { %s386_s17 = sld [smem:[#allocation3]]  ;;  %p1099_p7 = scmp.eq.s32.totalorder %s888_s0, 1 }
 0x162   : > { %s751_s20 = scalar_lea.hbm %s1083_s5, 16 }
 0x163   : > { %p752_p13 = scmp.ne.s32.totalorder %s1083_s5, %s751_s20  ;;  %p1100_p10 = pmov %p1099_p7 }
 0x164   : > { %p757_p2 = scmp.lt.u32.totalorder %s751_s20, %s1083_s5 }
 0x165   : > { %p753_p11 = pnand %p752_p13, %p1100_p10 }
 0x167   : > { %p754_p0 = pneg %p753_p11 }
 0x169   : > { %p759_p3 = pnand %p757_p2, %p754_p0 }
 0x1e0   : > { %v378_v30 = vpop.xlane.xlu0 %377 }
 0x1e1   : > { %v379_v31 = vrot.slane %v378_v30, 4 }
 0x1e3   : > { %v380_v32 = vadd.f32 %v379_v31, %v378_v30 }
 0x1e5   : > { %v381_v33 = vrot.slane %v380_v32, 2 }
 0x1e7   : > { %v382_v34 = vadd.f32 %v381_v33, %v380_v32 }
 0x1e9   : > { %v383_v35 = vrot.slane %v382_v34, 1 }
 0x1eb   : > { %v384_v36 = vadd.f32 %v383_v35, %v382_v34 }
 0x1ed   : > { %566 = vpush %v384_v36 }
 0x21e   : > { %s567_s26 = spop %566 }
 0x21f   : > { %s387_s7 = sadd.f32 %s567_s26, %s386_s17 }
 0x221   : > { %389 = sst [smem:[#allocation3]] %s387_s7 }
 0x222   : > { %579 = sst [smem:[#allocation13]] (%p1099_p7), %s387_s7 }
 0x223   : > { %762 = shalt.err (!%p759_p3)
}
 0x224   : > { %s824_s14 = smov [#allocation13]   ;;  %p1101_p5 = pmov %p1099_p7 }
 0x226   : > { %582 = dma.smem_to_hbm (%p1101_p5), %s824_s14, 16, %s1083_s5, [#allocation9]  }
 0x227   : > { %p1102_p8 = pmov %p1101_p5 }
 0x228   : > { %p1103_p9 = pmov %p1101_p5 }
 0x229   : > { %790 = dma.done.wait (%p1102_p8), [#allocation9], 16  }
 0x22a   : > { %792 = vsyncadd (%p1103_p9), [#allocation9], 4294967280 }
 0x22b   : > { %428 = sfence }
 0x22c PF: > { %p605_p1 = scmp.ge.s32.totalorder %s811_s6, 2  ;;  %s437_s21 = sand.u32 1, %s799_s28  }
 0x22d   : > { %p1104_p12 = scmp.ne.s32.totalorder %s1089_s13, 0  ;;  %s438_s23 = scalar_lea.sflag [#allocation8], %s437_s21 }
 0x22f   : > { %p594_p4 = pnand %p605_p1, %p1104_p12 }
 0x231   : > { %794 = dma.done.wait (!%p594_p4), %s438_s23, 128  }
 0x232   : > { %796 = vsyncadd (!%p594_p4), %s438_s23, 4294967168  ;;  %p23_p6 = scmp.ge.s32.totalorder %s892_s8, 4   ;;  %s1105_s28 = smov %s803_s29 }
 0x233   : > { %s1106_s29 = smov %s807_s30  ;;  %s1107_s30 = smov %s903_s11 }
 0x234   : > { %s1108_s6 = smov %s892_s8  ;;  %25 = sbr.rel (!%p23_p6) target bundleno = 18 (0x12), region = 101 }
 0x23b   :  { %443 = vsyncpa [#allocation7], 1 }
 0x23c   :  { %445 = vsyncpa [#allocation7 + $0x1], 1 }
 0x23d   :  { %446 = vsyncpa [#allocation11], 1 }
 0x23e   :  { %447 = vsyncpa [#allocation8], 1 }
 0x23f   :  { %449 = vsyncpa [#allocation8 + $0x1], 1 }
 0x240   :  { %450 = vsyncpa [#allocation9], 1 }
 0x241   :  { %452 = vsyncpa [#allocation9 + $0x1], 1 }

</bundles_post_ra>
